<compile_context>
chip_gen: v7x
topology: tpu7x:2x2x1
jax: 0.10.0
libtpu: 0.0.40
codegen_flags: <defaults>
</compile_context>

<pallas_src>
import functools

import jax
import jax.numpy as jnp
from jax.experimental import pallas as pl
from jax.experimental.pallas import tpu as pltpu

_PD_EPS = 1e-6  # eps of torch.nn.functional.pairwise_distance (added to x1 - x2)

_VMEM_SPEC = pl.BlockSpec(memory_space=pltpu.MemorySpace.VMEM)


# --------------------------------------------------------------------------- #
# Hinge (margin) term                                                          #
# --------------------------------------------------------------------------- #
def _hinge_kernel(sent_ref, gloss_ref, mask_ref, ids_ref, out_ref, *, eps):
    B, N, D = gloss_ref.shape

    sent = sent_ref[...]                               # (B, D)   f32
    gloss = gloss_ref[...]                             # (B, N, D) f32
    mask = mask_ref[...]                               # (B, N)   f32
    ids = ids_ref[...]                                 # (B, 1)   int32

    # pairwise distances d[i, j] = || sentence[i] - all_gloss[i, j] + 1e-6 ||_2
    diff = sent[:, None, :] - gloss + _PD_EPS          # (B, N, D)
    d = jnp.sqrt(jnp.sum(diff * diff, axis=-1))        # (B, N)

    jidx = jax.lax.broadcasted_iota(jnp.int32, (B, N), 1)   # (B, N)

    # pos[i] = d[i, sense_ids[i]]
    onehot_pos = jidx == ids                                 # (B, N) bool
    pos = jnp.sum(jnp.where(onehot_pos, d, 0.0), axis=1)     # (B,)

    # candidate distances: valid (mask != 0) non-target senses keep d, else 10.0
    # (matches the reference's list-with-10 sentinel)
    valid = (mask != 0.0) & jnp.logical_not(onehot_pos)
    cand = jnp.where(valid, d, 10.0)                         # (B, N)

    # first index achieving the minimum (matches list.index(min(list)))
    min_val = jnp.min(cand, axis=1, keepdims=True)           # (B, 1)
    idx = jnp.min(jnp.where(cand == min_val, jidx, N), axis=1, keepdims=True)

    # neg[i] = || sentence[i] - all_gloss[i, min_index] + 1e-6 ||_2 == d[i, idx]
    neg = jnp.sum(jnp.where(jidx == idx, d, 0.0), axis=1)    # (B,)

    hinge = jnp.maximum(pos - neg + eps, 0.0)                # (B,)
    out_ref[...] = jnp.sum(hinge).reshape(1, 1)


def hinge_term(sentence, all_gloss, sense_mask, sense_ids, eps):
    B, N, D = all_gloss.shape
    ids2d = sense_ids.astype(jnp.int32).reshape(B, 1)
    out = pl.pallas_call(
        functools.partial(_hinge_kernel, eps=float(eps)),
        out_shape=jax.ShapeDtypeStruct((1, 1), jnp.float32),
        in_specs=[_VMEM_SPEC] * 4,
        out_specs=_VMEM_SPEC,
    )(sentence.astype(jnp.float32),
      all_gloss.astype(jnp.float32),
      sense_mask.astype(jnp.float32),
      ids2d)
    return out[0, 0]


# --------------------------------------------------------------------------- #
# Alpha regularizer (depends only on alpha -> compute once per step)           #
# --------------------------------------------------------------------------- #
def _alpha_reg_kernel(alpha_t_ref, out_ref):
    # alpha_t is lane-dense: shape (Na, M) with the long M axis on the lanes.
    a = alpha_t_ref[...]                                  # (Na, M) f32
    col_sum = jnp.sum(a, axis=0, keepdims=True)           # (1, M)  sublane reduce
    tmp = jnp.where(col_sum == 0.0, 1.0, a)               # rows whose sum==0 -> ones
    col_max = jnp.max(tmp, axis=0)                        # (M,)    sublane reduce
    out_ref[...] = jnp.sum(jnp.abs(col_max - 1.0)).reshape(1, 1)


def alpha_regularizer(alpha):
    """sum(|max(tmp, dim=1) - 1|) with zero-sum rows replaced by ones.

    Call this ONCE per training step and feed the result into marginal_loss
    via `alpha_term=`; it is independent of the per-word hinge inputs.
    """
    Ra, Rb, Na = alpha.shape
    M = Ra * Rb
    # Lane-dense layout: (M, Na) would pad Na 10 -> 128 lanes (12.8x waste);
    # (Na, M) puts the long axis on lanes instead.  Transpose is wrapper glue.
    a_t = alpha.astype(jnp.float32).reshape(M, Na).T      # (Na, M)
    out = pl.pallas_call(
        _alpha_reg_kernel,
        out_shape=jax.ShapeDtypeStruct((1, 1), jnp.float32),
        in_specs=[_VMEM_SPEC],
        out_specs=_VMEM_SPEC,
    )(a_t)
    return out[0, 0]


# --------------------------------------------------------------------------- #
# Full Marginal_loss forward                                                   #
# --------------------------------------------------------------------------- #
def marginal_loss(sentence, all_gloss, sense_mask, sense_ids, alpha=None,
                  *, eps, mode, alpha_term=None):
    """Returns (loss, hinge_sum, alpha_term) like the PyTorch module.

    Pass `alpha_term=` (precomputed once via alpha_regularizer) to keep the
    alpha DMA / reduction out of the per-word hot path.
    """
    if alpha_term is None:
        alpha_term = alpha_regularizer(alpha)

    hinge_sum = hinge_term(sentence, all_gloss, sense_mask, sense_ids, eps)

    if mode == 'train':
        loss = hinge_sum * 0.875 + alpha_term * 0.125
    else:
        loss = hinge_sum
    return loss, hinge_sum, alpha_term


if __name__ == "__main__":
    key = jax.random.PRNGKey(0)
    B, N, D = 8, 10, 32          # batch, senses per word, LSTMHD (small for demo)
    Ra, Rb, Na = 16, 6, 10       # alpha (2700, 6, 10) shrunk to (16, 6, 10)

    k1, k2, k3, k4, k5 = jax.random.split(key, 5)
    sentence = jax.random.normal(k1, (B, D), jnp.float32)
    all_gloss = jax.random.normal(k2, (B, N, D), jnp.float32)

    # sense_mask: 1024 for valid senses, 0 otherwise (at least 2 valid per row)
    nsense = jax.random.randint(k3, (B,), 2, N + 1)
    jidx = jax.lax.broadcasted_iota(jnp.int32, (B, N), 1)
    sense_mask = jnp.where(jidx < nsense[:, None], 1024.0, 0.0).astype(jnp.float32)

    # target sense id always within the valid range
    sense_ids = jax.random.randint(k4, (B,), 0, 2)

    alpha = jax.random.uniform(k5, (Ra, Rb, Na), jnp.float32)
    alpha = alpha.at[0].set(0.0)   # exercise the "row sum == 0 -> ones" path

    eps = 0.5

    # Hoisted: alpha regularizer computed once per step ...
    a_term = alpha_regularizer(alpha)
    # ... then reused across (potentially many) per-word loss calls.
    out_train = marginal_loss(sentence, all_gloss, sense_mask, sense_ids,
                              eps=eps, mode='train', alpha_term=a_term)
    out_eval = marginal_loss(sentence, all_gloss, sense_mask, sense_ids, alpha,
                             eps=eps, mode='eval')
    jax.block_until_ready(out_train)
    jax.block_until_ready(out_eval)
    print("KERNEL_OK")
</pallas_src>

<mosaic_0001>
module attributes {stable_mosaic.version = 11 : i64} {
  func.func @_alpha_reg_kernel(%arg0: memref<10x96xf32, #tpu.memory_space<vmem>>, %arg1: memref<1x1xf32, #tpu.memory_space<vmem>>) attributes {dimension_semantics = [], scalar_prefetch = 0 : i64, scratch_operands = 0 : i64, tpu.core_type = #tpu.core_type<tc>} {
    %c0 = arith.constant 0 : index
    %c0_0 = arith.constant 0 : index
    %0 = vector.load %arg0[%c0, %c0_0] : memref<10x96xf32, #tpu.memory_space<vmem>>, vector<10x96xf32>
    %cst = arith.constant dense<0.000000e+00> : vector<96xf32>
    %1 = vector.multi_reduction <add>, %0, %cst [0] : vector<10x96xf32> to vector<96xf32>
    %2 = vector.shape_cast %1 : vector<96xf32> to vector<1x96xf32>
    %cst_1 = arith.constant 0.000000e+00 : f32
    %3 = vector.broadcast %cst_1 : f32 to vector<1x96xf32>
    %4 = arith.cmpf oeq, %2, %3 : vector<1x96xf32>
    %cst_2 = arith.constant 1.000000e+00 : f32
    %5 = vector.shape_cast %4 : vector<1x96xi1> to vector<1x96xi1>
    %6 = vector.broadcast %5 : vector<1x96xi1> to vector<10x96xi1>
    %7 = vector.broadcast %cst_2 : f32 to vector<10x96xf32>
    %8 = arith.select %6, %7, %0 : vector<10x96xi1>, vector<10x96xf32>
    %cst_3 = arith.constant dense<0xFF800000> : vector<96xf32>
    %9 = vector.multi_reduction <maximumf>, %8, %cst_3 [0] : vector<10x96xf32> to vector<96xf32>
    %cst_4 = arith.constant 1.000000e+00 : f32
    %10 = vector.broadcast %cst_4 : f32 to vector<96xf32>
    %11 = arith.subf %9, %10 : vector<96xf32>
    %12 = math.absf %11 : vector<96xf32>
    %13 = vector.shape_cast %12 : vector<96xf32> to vector<1x96xf32>
    %cst_5 = arith.constant dense<0.000000e+00> : vector<1xf32>
    %14 = vector.multi_reduction <add>, %13, %cst_5 [1] : vector<1x96xf32> to vector<1xf32>
    %15 = vector.shape_cast %14 : vector<1xf32> to vector<1x1xf32>
    %16 = vector.extract %15[0, 0] : f32 from vector<1x1xf32>
    %17 = vector.broadcast %16 : f32 to vector<1x1xf32>
    %c0_6 = arith.constant 0 : index
    %c0_7 = arith.constant 0 : index
    %18 = vector.load %arg1[%c0_6, %c0_7] : memref<1x1xf32, #tpu.memory_space<vmem>>, vector<1x1xf32>
    tpu.vector_store %arg1[%c0_6, %c0_7], %17 {strides = array<i32>} : memref<1x1xf32, #tpu.memory_space<vmem>>, vector<1x1xf32>,
    return
  }
}

</mosaic_0001>

<bundles_post_ra>
// kernel: tpu_custom_call.1
= control target key start
LH: loop header
LB: loop body
LE: loop exit
PB: predicated region body
PF: predicated region fallthrough
CT: control target
= control target key end

     0   :  { %6 = vsyncpa [#allocation3], 0  ;;  %s172_s0 = inlined_call_operand.hbm [shape: f32[10,96], index: 0, kind: input, shape index: {}]   ;;  %s173_s1 = inlined_call_operand.hbm [shape: f32[1,1], index: 1, kind: output, shape index: {}]  }
   0x1   :  { %7 = vsyncpa [#allocation4], 0  ;;  %s129_s6 = smov [#allocation2]   ;;  %s81_s10 = scalar_lea.hbm %s172_s0, 256 }
   0x2   :  { %s13_s7 = sshll.u32 %s129_s6, 4  ;;  %p82_p0 = scmp.ne.s32.totalorder %s172_s0, %s81_s10  ;;  %s14_s7 = int_to_ptr.vmem [resolvable:$true] %s13_s7 }
   0x3   :  { %p85_p1 = scmp.lt.u32.totalorder %s81_s10, %s172_s0 }
   0x5   :  { %p87_p2 = pnand %p85_p1, %p82_p0 }
   0x7   :  { %90 = shalt.err (!%p87_p2)
}
   0x8   :  { %s91_s15 = scalar_lea.vmem %s14_s7, 256  ;;  %p96_p4 = scmp.lt.s32.totalorder %s14_s7, %s14_s7 }
   0x9   :  { %p92_p3 = scmp.ne.s32.totalorder %s14_s7, %s91_s15  ;;  %p97_p5 = scmp.lt.s32.totalorder %s91_s15, %s91_s15 }
   0xb   :  { %p98_p6 = por %p97_p5, %p96_p4 }
   0xd   :  { %p99_p7 = pnand %p98_p6, %p92_p3 }
   0xf   :  { %102 = shalt.err (!%p99_p7)
}
  0x10   :  { %s130_s16 = smov 128   ;;  %s131_s17 = smov 8  }
  0x11   :  { %19 = dma.hbm_to_vmem [thread:$0]  %s172_s0, 256, %s14_s7, [#allocation3], %s130_s16, %s130_s16, %s131_s17  }
  0x12   :  { %125 = dma.done.wait [#allocation3], 256  }
  0x13   :  { %126 = vsyncadd [#allocation3], 4294967040  ;;  %vm25_vm0 = vcmask 785408   ;;  %vm27_vm1 = vcmask 779264   ;;  %v23_v0 = vld [vmem:[#allocation2] sm:$0xff]  ;;  %s132_s0 = smov [#allocation5]  }
  0x14   :  { %v24_v1 = vld [vmem:[#allocation2 + $0x8] sm:$0x3]  ;;  %v26_v2 = vsel %vm25_vm0, %v23_v0, 0.0  ;;  %s65_s20 = sshll.u32 %s132_s0, 4  ;;  %vm57_vm3 = vcmask 0   ;;  %s66_s20 = int_to_ptr.vmem [resolvable:$true] %s65_s20 }
  0x15   :  { %v28_v3 = vsel %vm27_vm1, %v24_v1, 0.0  ;;  %s103_s22 = scalar_lea.vmem %s66_s20, 16  ;;  %s107_s23 = scalar_lea.vmem %s66_s20, 32 }
  0x16   :  { %v29_v4 = vadd.f32 %v28_v3, %v26_v2  ;;  %p104_p8 = scmp.ne.s32.totalorder %s66_s20, %s103_s22  ;;  %p108_p9 = scmp.lt.s32.totalorder %s66_s20, %s66_s20 }
  0x17   :  { %p109_p10 = scmp.lt.s32.totalorder %s107_s23, %s103_s22 }
  0x18   :  { %v30_v5 = vrot.slane %v29_v4, 4 }
  0x19   :  { %p110_p11 = por %p109_p10, %p108_p9 }
  0x1a   :  { %v31_v6 = vadd.f32 %v30_v5, %v29_v4 }
  0x1b   :  { %p111_p12 = pnand %p110_p11, %p104_p8 }
  0x1c   :  { %v32_v7 = vrot.slane %v31_v6, 2 }
  0x1e   :  { %v33_v8 = vadd.f32 %v32_v7, %v31_v6 }
  0x20   :  { %v34_v9 = vrot.slane %v33_v8, 1 }
  0x22   :  { %v35_v10 = vadd.f32 %v34_v9, %v33_v8 }
  0x24   :  { %vm36_vm2 = vcmp.eq.f32.partialorder %v35_v10, 0.0 }
  0x25   :  { %v39_v11 = vsel %vm36_vm2, 1.0, %v23_v0  ;;  %v40_v12 = vsel %vm36_vm2, 1.0, %v24_v1 }
  0x26   :  { %v41_v13 = vsel %vm25_vm0, %v39_v11, -inf  ;;  %v42_v14 = vsel %vm27_vm1, %v40_v12, -inf }
  0x27   :  { %v43_v15 = vmax.f32 %v41_v13, %v42_v14 }
  0x29   :  { %v44_v16 = vrot.slane %v43_v15, 4 }
  0x2b   :  { %v45_v17 = vmax.f32 %v43_v15, %v44_v16 }
  0x2d   :  { %v46_v18 = vrot.slane %v45_v17, 2 }
  0x2f   :  { %v47_v19 = vmax.f32 %v45_v17, %v46_v18 }
  0x31   :  { %v48_v20 = vrot.slane %v47_v19, 1 }
  0x33   :  { %v49_v21 = vmax.f32 %v47_v19, %v48_v20 }
  0x35   :  { %v74_v22 = vadd.f32 -1.0, %v49_v21 }
  0x37   :  { %v51_v23 = vand.u32 2147483647, %v74_v22 }
  0x39   :  { %v52_v24 = vsel %vm25_vm0, %v51_v23, 0.0 }
  0x3a   :  { %53 = vadd.xlane.f32.xlu0 %v52_v24 }
  0xc7   :  { %v54_v25 = vpop.xlane.xlu0 %53 }
  0xc8   :  { %75 = vpush %v54_v25 }
  0xf9   :  { %s76_s21 = spop %75 }
  0xfa   :  { %v56_v26 = vstv %s76_s21 }
  0xfb   :  { %58 = vst.msk [vmem:[#allocation5] sm:$0x1] %vm57_vm3, %v56_v26 }
  0xfc   :  { %114 = shalt.err (!%p111_p12)
}
  0xfd   :  { %s115_s26 = scalar_lea.hbm %s173_s1, 16 }
  0xfe   :  { %p116_p13 = scmp.ne.s32.totalorder %s173_s1, %s115_s26  ;;  %p119_p0 = scmp.lt.u32.totalorder %s115_s26, %s173_s1 }
 0x100   :  { %p121_p1 = pnand %p119_p0, %p116_p13 }
 0x102   :  { %124 = shalt.err (!%p121_p1)
}
 0x103   :  { %68 = dma.vmem_to_hbm [thread:$0]  %s66_s20, 16, %s173_s1, [#allocation4]  }
 0x104   :  { %127 = dma.done.wait [#allocation4], 16  }
 0x105   :  { %128 = vsyncadd [#allocation4], 4294967280 }
 0x106   :  { %72 = vsyncpa [#allocation3], 1 }
 0x107   :  { %73 = vsyncpa [#allocation4], 1 }

</bundles_post_ra>
